<compile_context>
chip_gen: v7x
topology: tpu7x:2x2x1
jax: 0.10.0
libtpu: 0.0.40
codegen_flags: <defaults>
</compile_context>

<pallas_src>
import jax
import jax.numpy as jnp
from jax.experimental import pallas as pl
from jax.experimental.pallas import tpu as pltpu


def _chomp_copy_kernel(x_ref, o_ref):
    # 2D path: input/output blocks have identical shapes -> pure copy.
    # Small-L path: input block carries the full L lanes -> static prefix slice.
    o_ref[...] = x_ref[:, : o_ref.shape[-1]]


def _round_up(x: int, m: int) -> int:
    return -(-x // m) * m


def _round_down(x: int, m: int) -> int:
    return (x // m) * m


def _sublane_multiple(dtype) -> int:
    # Sub-32-bit dtypes pack along sublanes: f32 -> 8, bf16 -> 16, int8 -> 32.
    return max(8, 32 // jnp.dtype(dtype).itemsize)


def _vmem_limit_bytes() -> int:
    """Scoped-VMEM budget derived from the chip (v7x 64 MiB, v5e/v6e 128 MiB)."""
    cap = 0
    try:
        cap = int(pltpu.get_tpu_info().vmem_capacity_bytes)
    except Exception:
        cap = 0
    if cap <= 0:
        cap = 64 * 1024 * 1024  # conservative fallback = v7x physical VMEM
    # Half of physical, capped at 64 MiB: 32 MiB on v7x, 64 MiB on v5e/v6e.
    return min(cap // 2, 64 * 1024 * 1024)


_TARGET_STEPS = 4           # v7x megacore: prefer >= 4 roughly even steps
_MIN_BLOCK_BYTES = 1 << 20  # ...but never shrink a step below ~1 MiB of traffic


def _pick_row_tile(nc: int, sub: int, pair_row_bytes: int,
                   block_budget_bytes: int, other_steps: int = 1) -> int:
    """Sublane-aligned rows-per-block: VMEM-budgeted and megacore-balanced."""
    if nc <= sub:
        return nc  # one full-extent row block (block dim == array dim)
    max_tr = _round_down(nc, sub)  # keep the block dim <= the array dim
    tr = _round_down(max(block_budget_bytes // max(pair_row_bytes, 1), sub), sub)
    tr = max(sub, min(tr, max_tr))
    # Prefer >= _TARGET_STEPS roughly even parallel steps (v7x shards
    # "parallel" grid axes across 2 TensorCores), never below _MIN_BLOCK_BYTES.
    for _ in range(8):
        if pl.cdiv(nc, tr) * other_steps >= _TARGET_STEPS:
            break
        nr = pl.cdiv(nc, tr) * 2
        new_tr = max(sub, _round_up(pl.cdiv(nc, nr), sub))
        if new_tr >= tr or new_tr * pair_row_bytes < _MIN_BLOCK_BYTES:
            break
        tr = new_tr
    return tr


def chomp1d(x: jax.Array, chomp_size: int) -> jax.Array:
    """Pallas equivalent of Chomp1d(chomp_size)(x) for x of shape (N, C, L)."""
    assert x.ndim == 3, "expected (N, C, L) input"
    n, c, l = x.shape
    # Deliberate deviation from PyTorch: chomp_size == 0 (empty result in
    # torch) is rejected rather than returning an empty tensor.
    assert 0 < chomp_size < l, "chomp_size must be in (0, L)"
    l_out = l - chomp_size

    nc = n * c
    # Free (row-major) reshape to contiguous rows. If a producer ever hands us
    # a non-default layout, switch to a 3D BlockSpec with pl.Squeezed() instead
    # of reshaping (a layout-changing reshape would add a hidden HBM copy).
    x2 = x.reshape(nc, l)

    dsize = jnp.dtype(x.dtype).itemsize
    sub = _sublane_multiple(x.dtype)

    vmem_limit = _vmem_limit_bytes()
    # Per-step (input block + output block) budget, leaving headroom for the
    # default double buffering plus internal scratch.
    block_budget = (vmem_limit * 3) // 8

    if l_out >= 128:
        # --- 2D grid: rows x 128-multiple column blocks, single pure copy. ---
        max_tc = _round_down(l_out, 128)          # block col dim <= array dim
        tc = min(max_tc, 512)
        tr = _pick_row_tile(nc, sub, 2 * tc * dsize, block_budget,
                            other_steps=pl.cdiv(l_out, tc))
        if pl.cdiv(nc, tr) == 1 and tc < max_tc:
            # All rows fit one block: spend leftover budget on wider columns,
            # then rebalance so v7x still gets >= 4 (>= 1 MiB) column steps.
            widened = _round_down(
                max(block_budget // (2 * dsize * max(tr, 1)), 128), 128)
            tc = max(tc, min(max_tc, widened))
            for _ in range(8):
                steps = pl.cdiv(l_out, tc)
                if steps >= _TARGET_STEPS:
                    break
                new_tc = max(128, _round_up(pl.cdiv(l_out, steps * 2), 128))
                if new_tc >= tc or tr * new_tc * 2 * dsize < _MIN_BLOCK_BYTES:
                    break
                tc = new_tc

        grid = (pl.cdiv(nc, tr), pl.cdiv(l_out, tc))
        in_specs = [pl.BlockSpec((tr, tc), lambda r, c: (r, c))]
        out_specs = pl.BlockSpec((tr, tc), lambda r, c: (r, c))
        dim_sem = ("parallel", "parallel")
        # Input columns actually DMA'd (the tail past the last column block
        # never leaves HBM).
        in_cols_read = min(grid[1] * tc, l)
    else:
        # --- Tiny sequence (< 1 lane tile): 1D row grid, full-extent columns.
        # Full-extent last dims are the only legal non-128-multiple blocks; the
        # kernel drops the chomped tail with a static slice.
        tr = _pick_row_tile(nc, sub, (l + l_out) * dsize, block_budget)
        grid = (pl.cdiv(nc, tr),)
        in_specs = [pl.BlockSpec((tr, l), lambda r: (r, 0))]
        out_specs = pl.BlockSpec((tr, l_out), lambda r: (r, 0))
        dim_sem = ("parallel",)
        in_cols_read = l

    out2 = pl.pallas_call(
        _chomp_copy_kernel,
        out_shape=jax.ShapeDtypeStruct((nc, l_out), x.dtype),
        grid_spec=pltpu.PrefetchScalarGridSpec(
            num_scalar_prefetch=0,
            grid=grid,
            in_specs=in_specs,
            out_specs=out_specs,
        ),
        compiler_params=pltpu.CompilerParams(
            dimension_semantics=dim_sem,
            vmem_limit_bytes=vmem_limit,
        ),
        cost_estimate=pl.CostEstimate(
            flops=0,
            transcendentals=0,
            bytes_accessed=nc * (in_cols_read + l_out) * dsize,
        ),
    )(x2)

    return out2.reshape(n, c, l_out)


if __name__ == "__main__":
    key = jax.random.PRNGKey(0)

    def check(n, c, l, chomp, seed):
        x = jax.random.normal(jax.random.fold_in(key, seed), (n, c, l),
                              dtype=jnp.float32)
        out = jax.block_until_ready(chomp1d(x, chomp))
        ref = x[:, :, :-chomp]
        assert out.shape == (n, c, l - chomp), (out.shape, (n, c, l - chomp))
        assert out.dtype == x.dtype
        assert bool(jnp.all(out == ref)), f"mismatch for {(n, c, l, chomp)}"

    # 1) Tiny TCN-like feature map, L_out < 128 -> 1D full-row-block path.
    check(2, 4, 16, 3, seed=0)
    # 2) Lane-aligned L_out (=128) -> 2D path; chomped tail never leaves HBM.
    check(2, 4, 131, 3, seed=1)
    # 3) Unaligned L_out >= 128 -> 2D path with a masked ragged column block.
    check(2, 4, 300, 10, seed=2)
    # 4) Row count not a sublane multiple -> masked ragged row block.
    check(3, 3, 300, 44, seed=3)

    print("KERNEL_OK")
</pallas_src>

<mosaic_0001>
module attributes {stable_mosaic.version = 11 : i64} {
  func.func @_chomp_copy_kernel(%arg0: i32, %arg1: memref<8x16xf32, #tpu.memory_space<vmem>>, %arg2: memref<8x13xf32, #tpu.memory_space<vmem>>) attributes {dimension_semantics = [#tpu.dimension_semantics<parallel>], iteration_bounds = array<i64: 1>, scalar_prefetch = 0 : i64, scratch_operands = 0 : i64, tpu.core_type = #tpu.core_type<tc>, window_params = [{transform_indices = @transform_0, window_bounds = array<i64: 8, 16>}, {transform_indices = @transform_1, window_bounds = array<i64: 8, 13>}]} {
    %c0 = arith.constant 0 : index
    %c0_0 = arith.constant 0 : index
    %0 = vector.load %arg1[%c0, %c0_0] : memref<8x16xf32, #tpu.memory_space<vmem>>, vector<8x13xf32>
    %c0_1 = arith.constant 0 : index
    %c0_2 = arith.constant 0 : index
    %1 = vector.load %arg2[%c0_1, %c0_2] : memref<8x13xf32, #tpu.memory_space<vmem>>, vector<8x13xf32>
    tpu.vector_store %arg2[%c0_1, %c0_2], %0 {strides = array<i32>} : memref<8x13xf32, #tpu.memory_space<vmem>>, vector<8x13xf32>,
    return
  }
  func.func @transform_0(%arg0: i32) -> (i32, i32) {
    %c0_i32 = arith.constant 0 : i32
    %c0_i32_0 = arith.constant 0 : i32
    return %arg0, %c0_i32 : i32, i32
  }
  func.func @transform_1(%arg0: i32) -> (i32, i32) {
    %c0_i32 = arith.constant 0 : i32
    %c0_i32_0 = arith.constant 0 : i32
    return %arg0, %c0_i32 : i32, i32
  }
}

</mosaic_0001>

<bundles_post_ra>
// kernel: tpu_custom_call.1
= control target key start
LH: loop header
LB: loop body
LE: loop exit
PB: predicated region body
PF: predicated region fallthrough
CT: control target
= control target key end

     0   :  { %6 = vsyncpa [#allocation3], 0  ;;  %s125_s0 = inlined_call_operand.hbm [shape: f32[8,16], index: 0, kind: input, shape index: {}]   ;;  %s126_s1 = inlined_call_operand.hbm [shape: f32[8,13], index: 1, kind: output, shape index: {}]  }
   0x1   :  { %7 = vsyncpa [#allocation4], 0  ;;  %s89_s6 = smov [#allocation2]   ;;  %s41_s10 = scalar_lea.hbm %s125_s0, 128 }
   0x2   :  { %s14_s7 = sshll.u32 %s89_s6, 4  ;;  %p42_p0 = scmp.ne.s32.totalorder %s125_s0, %s41_s10  ;;  %s15_s7 = int_to_ptr.vmem [resolvable:$true] %s14_s7 }
   0x3   :  { %p45_p1 = scmp.lt.u32.totalorder %s41_s10, %s125_s0 }
   0x5   :  { %p47_p2 = pnand %p45_p1, %p42_p0 }
   0x7   :  { %50 = shalt.err (!%p47_p2)
}
   0x8   :  { %s51_s15 = scalar_lea.vmem %s15_s7, 128  ;;  %p56_p4 = scmp.lt.s32.totalorder %s15_s7, %s15_s7 }
   0x9   :  { %p52_p3 = scmp.ne.s32.totalorder %s15_s7, %s51_s15  ;;  %p57_p5 = scmp.lt.s32.totalorder %s51_s15, %s51_s15 }
   0xb   :  { %p58_p6 = por %p57_p5, %p56_p4 }
   0xd   :  { %p59_p7 = pnand %p58_p6, %p52_p3 }
   0xf   :  { %62 = shalt.err (!%p59_p7)
}
  0x10   :  { %17 = dma.hbm_to_vmem [thread:$0]  %s125_s0, 128, %s15_s7, [#allocation3]  }
  0x11   :  { %85 = dma.done.wait [#allocation3], 128  }
  0x12   :  { %86 = vsyncadd [#allocation3], 4294967168  ;;  %s90_s18 = smov [#allocation5]   ;;  %vm22_vm0 = vcmask 105472   ;;  %v21_v0 = vld [vmem:[#allocation2] sm:$0xff] }
  0x13   :  { %s30_s19 = sshll.u32 %s90_s18, 4  ;;  %23 = vst.msk [vmem:[#allocation5] sm:$0xff] %vm22_vm0, %v21_v0  ;;  %s31_s19 = int_to_ptr.vmem [resolvable:$true] %s30_s19 }
  0x14   :  { %s63_s20 = scalar_lea.vmem %s31_s19, 128  ;;  %p68_p9 = scmp.lt.s32.totalorder %s31_s19, %s31_s19 }
  0x15   :  { %p64_p8 = scmp.ne.s32.totalorder %s31_s19, %s63_s20  ;;  %p69_p10 = scmp.lt.s32.totalorder %s63_s20, %s63_s20 }
  0x17   :  { %p70_p11 = por %p69_p10, %p68_p9 }
  0x19   :  { %p71_p12 = pnand %p70_p11, %p64_p8 }
  0x1b   :  { %74 = shalt.err (!%p71_p12)
}
  0x1c   :  { %s75_s23 = scalar_lea.hbm %s126_s1, 128 }
  0x1d   :  { %p76_p13 = scmp.ne.s32.totalorder %s126_s1, %s75_s23  ;;  %p79_p0 = scmp.lt.u32.totalorder %s75_s23, %s126_s1 }
  0x1f   :  { %p81_p1 = pnand %p79_p0, %p76_p13 }
  0x21   :  { %84 = shalt.err (!%p81_p1)
}
  0x22   :  { %33 = dma.vmem_to_hbm [thread:$0]  %s31_s19, 128, %s126_s1, [#allocation4]  }
  0x23   :  { %87 = dma.done.wait [#allocation4], 128  }
  0x24   :  { %88 = vsyncadd [#allocation4], 4294967168 }
  0x25   :  { %37 = vsyncpa [#allocation3], 1 }
  0x26   :  { %38 = vsyncpa [#allocation4], 1 }

</bundles_post_ra>
